<compile_context>
chip_gen: v6e
topology: v6e:2x2x1
jax: 0.10.0
libtpu: 0.0.40
codegen_flags: <defaults>
</compile_context>

<pallas_src>
import jax
import jax.numpy as jnp
from jax.experimental import pallas as pl
from jax.experimental.pallas import tpu as pltpu


def _make_kernel(width, n_valid, bt, blocks_per_chunk, total_rows, ragged):
    """Kernel over a (bt, H*W) block of flattened (N*C, H*W) slabs.

    width            = W          (static)
    n_valid          = (H - 1)*W  (static): flat positions with a valid +W neighbour
    blocks_per_chunk = reduction-axis extent per parallel chunk (static)
    total_rows       = N*C (static); used for the ragged-tail row mask
    """

    def kernel(f_ref, r_ref, m_ref, valid_ref, num_ref, den_ref):
        b = pl.program_id(1)                       # reduction step inside chunk

        @pl.when(b == 0)
        def _init():
            num_ref[...] = jnp.zeros_like(num_ref)
            den_ref[...] = jnp.zeros_like(den_ref)

        # Cast to f32 inside the kernel (inputs are DMA'd at native dtype).
        f = f_ref[...].astype(jnp.float32)         # (bt, H*W)
        r = r_ref[...].astype(jnp.float32)
        m = m_ref[...].astype(jnp.float32)
        valid = valid_ref[...]                     # (1, n_valid) f32

        f0, r0, m0 = f[:, :n_valid], r[:, :n_valid], m[:, :n_valid]
        # dx: +1 neighbour along the flat axis; dy: +W neighbour.
        f_dx = f[:, 1:n_valid + 1] - f0
        f_dy = f[:, width:] - f0
        r_dx = r[:, 1:n_valid + 1] - r0
        r_dy = r[:, width:] - r0
        m_dx = m[:, 1:n_valid + 1] * m0
        m_dy = m[:, width:] * m0

        inner = f_dx * r_dx + f_dy * r_dy
        p_sq = f_dx * f_dx + f_dy * f_dy
        g_sq = r_dx * r_dx + r_dy * r_dy
        # Two rsqrt (EUP) instead of rsqrt of the product: avoids f32 overflow.
        loss = 1.0 - (inner + 1.0) * (jax.lax.rsqrt(p_sq + 1.0)
                                      * jax.lax.rsqrt(g_sq + 1.0))

        # Gradient-mask product, with wrapped-column (w == W-1) positions zeroed.
        mc = m_dx * m_dy * valid
        contrib = loss * mc

        if ragged:
            # Select away rows past N*C (undefined padding of the partial /
            # duplicated tail block) — select is NaN-safe.
            c = pl.program_id(0)
            block_idx = c * blocks_per_chunk + b
            row = block_idx * bt + jax.lax.broadcasted_iota(jnp.int32, (bt, 1), 0)
            rv = row < total_rows
            contrib = jnp.where(rv, contrib, 0.0)
            mc = jnp.where(rv, mc, 0.0)

        # Per-step scalar reduce accumulated into the resident (1,1) outputs.
        num_ref[...] = num_ref[...] + jnp.sum(contrib)
        den_ref[...] = den_ref[...] + jnp.sum(mc)

    return kernel


def _reference_normal_loss(fake, real, mask):
    """Pure-JAX reference mirroring the PyTorch module (also the fallback)."""
    def grad(d, m):
        d_dy = d[:, :, 1:, :] - d[:, :, :-1, :]
        d_dx = d[:, :, :, 1:] - d[:, :, :, :-1]
        m_dy = m[:, :, 1:, :] * m[:, :, :-1, :]
        m_dx = m[:, :, :, 1:] * m[:, :, :, :-1]
        return d_dx, d_dy, m_dx, m_dy

    p_dx, p_dy, _, _ = grad(fake, mask)
    g_dx, g_dy, g_m_dx, g_m_dy = grad(real, mask)
    inner = (p_dx * g_dx)[:, :, :-1, :] + (p_dy * g_dy)[:, :, :, :-1]
    p_sq = (p_dx ** 2)[:, :, :-1, :] + (p_dy ** 2)[:, :, :, :-1]
    g_sq = (g_dx ** 2)[:, :, :-1, :] + (g_dy ** 2)[:, :, :, :-1]
    loss = 1 - (inner + 1) / (jnp.sqrt(p_sq + 1) * jnp.sqrt(g_sq + 1))
    m = g_m_dx[:, :, :-1, :] * g_m_dy[:, :, :, :-1]
    return jnp.sum(loss * m) / (jnp.sum(m) + 1e-6)


def normal_loss(fake, real, mask):
    """Pallas implementation of NormalLoss.forward (NCHW inputs)."""
    if fake.shape != real.shape:
        _, _, H, W = real.shape
        # TODO(synk): torch F.upsample(bilinear) align_corners semantics can
        # differ slightly from jax.image.resize's half-pixel bilinear sampling.
        fake = jax.image.resize(fake, (fake.shape[0], fake.shape[1], H, W),
                                method="bilinear")

    N, C, H, W = real.shape
    if H < 2 or W < 2:
        return jnp.float32(0.0)          # no interior gradients -> loss is 0

    B, HW = N * C, H * W
    n_valid = (H - 1) * W

    # --- generation-aware VMEM budgeting ------------------------------------
    try:
        vmem_cap = int(pltpu.get_tpu_info().vmem_capacity_bytes)
    except Exception:
        vmem_cap = 64 * 1024 * 1024      # conservative (v7x-sized) default
    vmem_limit = min((vmem_cap * 3) // 4, 100 * 1024 * 1024)   # ~96 MiB v5e/v6e, ~48 MiB v7x
    budget = vmem_limit // 2             # headroom for compiler temporaries

    def fallback():
        return _reference_normal_loss(fake.astype(jnp.float32),
                                      real.astype(jnp.float32),
                                      mask.astype(jnp.float32))

    # Flatten each (n, c) slab to one lane-dense row — a free collapse of
    # contiguous dims (no HBM copy, no dtype cast, no pad pass).
    f = fake.reshape(B, HW)
    r = real.reshape(B, HW)
    m = mask.reshape(B, HW)
    if m.dtype == jnp.bool_:
        m = m.astype(jnp.uint8)          # keep the mask DMA narrow

    in_bytes = f.dtype.itemsize + r.dtype.itemsize + m.dtype.itemsize
    # Per batch-row: 3 double-buffered input slabs + ~16 live f32 intermediates.
    bytes_per_row = 2 * HW * in_bytes + 16 * n_valid * 4

    max_bt = budget // bytes_per_row
    if max_bt < 1:
        # TODO(synk): halo-tile the H axis inside the kernel for very large
        # spatial slabs instead of falling back to the XLA implementation.
        return fallback()

    # Aim for >= ~8 grid blocks so the double-buffered pipeline overlaps DMA
    # with compute, capped by the VMEM-derived block size.
    target_bt = -(-B // 8)
    bt = min(max_bt, max(target_bt, 8))
    if bt >= B:
        bt = B                           # full-extent leading block dim: legal
    else:
        bt = (bt // 8) * 8               # sublane-align the block's row dim
        if bt == 0:
            return fallback()

    num_blocks = -(-B // bt)
    n_chunks = 2 if num_blocks >= 2 else 1     # leading "parallel" axis (both TCs on v7x)
    bpc = -(-num_blocks // n_chunks)           # reduction steps per chunk
    ragged = (n_chunks * bpc != num_blocks) or (num_blocks * bt != B)

    # x-neighbour validity over the flattened (H-1, W) window: zero where the
    # +1 (dx) neighbour wraps to the next image row (w == W-1).
    col = jnp.arange(n_valid, dtype=jnp.int32) % W
    valid = (col < (W - 1)).astype(jnp.float32).reshape(1, n_valid)

    if ragged:
        def io_map(c, b):
            # Clamp so no block start is fully past the array (DMA bounds-safe);
            # duplicated tail blocks are zeroed by the in-kernel row mask.
            return (jnp.minimum(c * bpc + b, num_blocks - 1), 0)
    else:
        def io_map(c, b):
            return (c * bpc + b, 0)

    io_spec = pl.BlockSpec((bt, HW), io_map)
    valid_spec = pl.BlockSpec((1, n_valid), lambda c, b: (0, 0))   # resident, constant
    out_spec = pl.BlockSpec((1, 1), lambda c, b: (c, 0))           # per-chunk partial

    num, den = pl.pallas_call(
        _make_kernel(W, n_valid, bt, bpc, B, ragged),
        out_shape=(jax.ShapeDtypeStruct((n_chunks, 1), jnp.float32),
                   jax.ShapeDtypeStruct((n_chunks, 1), jnp.float32)),
        grid_spec=pltpu.PrefetchScalarGridSpec(
            num_scalar_prefetch=0,
            grid=(n_chunks, bpc),
            in_specs=[io_spec, io_spec, io_spec, valid_spec],
            out_specs=(out_spec, out_spec),
        ),
        compiler_params=pltpu.CompilerParams(
            dimension_semantics=("parallel", "arbitrary"),
            vmem_limit_bytes=int(vmem_limit),
        ),
    )(f, r, m, valid)

    return (jnp.sum(num) / (jnp.sum(den) + 1e-6)).astype(jnp.float32)


if __name__ == "__main__":
    key = jax.random.PRNGKey(0)
    k1, k2, k3 = jax.random.split(key, 3)
    N, C, H, W = 2, 4, 16, 16
    fake = jax.random.normal(k1, (N, C, H, W), dtype=jnp.float32)
    real = jax.random.normal(k2, (N, C, H, W), dtype=jnp.float32)
    mask = (jax.random.uniform(k3, (N, C, H, W)) > 0.3).astype(jnp.float32)

    out = normal_loss(fake, real, mask)
    out = jax.block_until_ready(out)

    ref = _reference_normal_loss(fake, real, mask)
    assert jnp.allclose(out, ref, atol=1e-5, rtol=1e-5), (out, ref)

    print("KERNEL_OK")
</pallas_src>

<mosaic_0001>
module attributes {stable_mosaic.version = 11 : i64} {
  func.func @kernel(%arg0: i32, %arg1: i32, %arg2: memref<8x256xf32, #tpu.memory_space<vmem>>, %arg3: memref<8x256xf32, #tpu.memory_space<vmem>>, %arg4: memref<8x256xf32, #tpu.memory_space<vmem>>, %arg5: memref<1x240xf32, #tpu.memory_space<vmem>>, %arg6: memref<1x1xf32, #tpu.memory_space<vmem>>, %arg7: memref<1x1xf32, #tpu.memory_space<vmem>>) attributes {dimension_semantics = [#tpu.dimension_semantics<parallel>, #tpu.dimension_semantics<arbitrary>], iteration_bounds = array<i64: 1, 1>, scalar_prefetch = 0 : i64, scratch_operands = 0 : i64, tpu.core_type = #tpu.core_type<tc>, window_params = [{transform_indices = @transform_0, window_bounds = array<i64: 8, 256>}, {transform_indices = @transform_1, window_bounds = array<i64: 8, 256>}, {transform_indices = @transform_2, window_bounds = array<i64: 8, 256>}, {pipeline_mode = #tpu.pipeline_mode<synchronous>, transform_indices = @transform_3, window_bounds = array<i64: 1, 240>}, {transform_indices = @transform_4, window_bounds = array<i64: 1, 1>}, {transform_indices = @transform_5, window_bounds = array<i64: 1, 1>}]} {
    %c0_i32 = arith.constant 0 : i32
    %0 = arith.cmpi eq, %arg1, %c0_i32 : i32
    %1 = arith.extui %0 : i1 to i32
    %c0_i32_0 = arith.constant 0 : i32
    %2 = arith.cmpi ne, %1, %c0_i32_0 : i32
    scf.if %2 {
      %cst_21 = arith.constant 0.000000e+00 : f32
      %63 = vector.broadcast %cst_21 : f32 to vector<1x1xf32>
      %c0_22 = arith.constant 0 : index
      %c0_23 = arith.constant 0 : index
      %64 = vector.load %arg6[%c0_22, %c0_23] : memref<1x1xf32, #tpu.memory_space<vmem>>, vector<1x1xf32>
      tpu.vector_store %arg6[%c0_22, %c0_23], %63 {strides = array<i32>} : memref<1x1xf32, #tpu.memory_space<vmem>>, vector<1x1xf32>,
      %cst_24 = arith.constant 0.000000e+00 : f32
      %65 = vector.broadcast %cst_24 : f32 to vector<1x1xf32>
      %c0_25 = arith.constant 0 : index
      %c0_26 = arith.constant 0 : index
      %66 = vector.load %arg7[%c0_25, %c0_26] : memref<1x1xf32, #tpu.memory_space<vmem>>, vector<1x1xf32>
      tpu.vector_store %arg7[%c0_25, %c0_26], %65 {strides = array<i32>} : memref<1x1xf32, #tpu.memory_space<vmem>>, vector<1x1xf32>,
    } else {
    }
    %c0 = arith.constant 0 : index
    %c0_1 = arith.constant 0 : index
    %3 = vector.load %arg2[%c0, %c0_1] : memref<8x256xf32, #tpu.memory_space<vmem>>, vector<8x256xf32>
    %c0_2 = arith.constant 0 : index
    %c0_3 = arith.constant 0 : index
    %4 = vector.load %arg3[%c0_2, %c0_3] : memref<8x256xf32, #tpu.memory_space<vmem>>, vector<8x256xf32>
    %c0_4 = arith.constant 0 : index
    %c0_5 = arith.constant 0 : index
    %5 = vector.load %arg4[%c0_4, %c0_5] : memref<8x256xf32, #tpu.memory_space<vmem>>, vector<8x256xf32>
    %c0_6 = arith.constant 0 : index
    %c0_7 = arith.constant 0 : index
    %6 = vector.load %arg5[%c0_6, %c0_7] : memref<1x240xf32, #tpu.memory_space<vmem>>, vector<1x240xf32>
    %7 = vector.extract_strided_slice %3 {offsets = [0, 0], sizes = [8, 240], strides = [1, 1]} : vector<8x256xf32> to vector<8x240xf32>
    %8 = vector.extract_strided_slice %4 {offsets = [0, 0], sizes = [8, 240], strides = [1, 1]} : vector<8x256xf32> to vector<8x240xf32>
    %9 = vector.extract_strided_slice %5 {offsets = [0, 0], sizes = [8, 240], strides = [1, 1]} : vector<8x256xf32> to vector<8x240xf32>
    %10 = vector.extract_strided_slice %3 {offsets = [0, 1], sizes = [8, 240], strides = [1, 1]} : vector<8x256xf32> to vector<8x240xf32>
    %11 = arith.subf %10, %7 : vector<8x240xf32>
    %12 = vector.extract_strided_slice %3 {offsets = [0, 16], sizes = [8, 240], strides = [1, 1]} : vector<8x256xf32> to vector<8x240xf32>
    %13 = arith.subf %12, %7 : vector<8x240xf32>
    %14 = vector.extract_strided_slice %4 {offsets = [0, 1], sizes = [8, 240], strides = [1, 1]} : vector<8x256xf32> to vector<8x240xf32>
    %15 = arith.subf %14, %8 : vector<8x240xf32>
    %16 = vector.extract_strided_slice %4 {offsets = [0, 16], sizes = [8, 240], strides = [1, 1]} : vector<8x256xf32> to vector<8x240xf32>
    %17 = arith.subf %16, %8 : vector<8x240xf32>
    %18 = vector.extract_strided_slice %5 {offsets = [0, 1], sizes = [8, 240], strides = [1, 1]} : vector<8x256xf32> to vector<8x240xf32>
    %19 = arith.mulf %18, %9 : vector<8x240xf32>
    %20 = vector.extract_strided_slice %5 {offsets = [0, 16], sizes = [8, 240], strides = [1, 1]} : vector<8x256xf32> to vector<8x240xf32>
    %21 = arith.mulf %20, %9 : vector<8x240xf32>
    %22 = arith.mulf %11, %15 : vector<8x240xf32>
    %23 = arith.mulf %13, %17 : vector<8x240xf32>
    %24 = arith.addf %22, %23 : vector<8x240xf32>
    %25 = arith.mulf %11, %11 : vector<8x240xf32>
    %26 = arith.mulf %13, %13 : vector<8x240xf32>
    %27 = arith.addf %25, %26 : vector<8x240xf32>
    %28 = arith.mulf %15, %15 : vector<8x240xf32>
    %29 = arith.mulf %17, %17 : vector<8x240xf32>
    %30 = arith.addf %28, %29 : vector<8x240xf32>
    %cst = arith.constant 1.000000e+00 : f32
    %31 = vector.broadcast %cst : f32 to vector<8x240xf32>
    %32 = arith.addf %24, %31 : vector<8x240xf32>
    %cst_8 = arith.constant 1.000000e+00 : f32
    %33 = vector.broadcast %cst_8 : f32 to vector<8x240xf32>
    %34 = arith.addf %27, %33 : vector<8x240xf32>
    %35 = math.rsqrt %34 : vector<8x240xf32>
    %cst_9 = arith.constant 1.000000e+00 : f32
    %36 = vector.broadcast %cst_9 : f32 to vector<8x240xf32>
    %37 = arith.addf %30, %36 : vector<8x240xf32>
    %38 = math.rsqrt %37 : vector<8x240xf32>
    %39 = arith.mulf %35, %38 : vector<8x240xf32>
    %40 = arith.mulf %32, %39 : vector<8x240xf32>
    %cst_10 = arith.constant 1.000000e+00 : f32
    %41 = vector.broadcast %cst_10 : f32 to vector<8x240xf32>
    %42 = arith.subf %41, %40 : vector<8x240xf32>
    %43 = arith.mulf %19, %21 : vector<8x240xf32>
    %44 = vector.broadcast %6 : vector<1x240xf32> to vector<8x240xf32>
    %45 = arith.mulf %43, %44 : vector<8x240xf32>
    %46 = arith.mulf %42, %45 : vector<8x240xf32>
    %c0_11 = arith.constant 0 : index
    %c0_12 = arith.constant 0 : index
    %47 = vector.load %arg6[%c0_11, %c0_12] : memref<1x1xf32, #tpu.memory_space<vmem>>, vector<1x1xf32>
    %48 = vector.shape_cast %46 : vector<8x240xf32> to vector<1x8x240xf32>
    %cst_13 = arith.constant dense<0.000000e+00> : vector<1xf32>
    %49 = vector.multi_reduction <add>, %48, %cst_13 [1, 2] : vector<1x8x240xf32> to vector<1xf32>
    %50 = vector.shape_cast %49 : vector<1xf32> to vector<1x1x1xf32>
    %51 = vector.extract %50[0, 0, 0] : f32 from vector<1x1x1xf32>
    %52 = vector.broadcast %51 : f32 to vector<1x1xf32>
    %53 = arith.addf %47, %52 : vector<1x1xf32>
    %c0_14 = arith.constant 0 : index
    %c0_15 = arith.constant 0 : index
    %54 = vector.load %arg6[%c0_14, %c0_15] : memref<1x1xf32, #tpu.memory_space<vmem>>, vector<1x1xf32>
    tpu.vector_store %arg6[%c0_14, %c0_15], %53 {strides = array<i32>} : memref<1x1xf32, #tpu.memory_space<vmem>>, vector<1x1xf32>,
    %c0_16 = arith.constant 0 : index
    %c0_17 = arith.constant 0 : index
    %55 = vector.load %arg7[%c0_16, %c0_17] : memref<1x1xf32, #tpu.memory_space<vmem>>, vector<1x1xf32>
    %56 = vector.shape_cast %45 : vector<8x240xf32> to vector<1x8x240xf32>
    %cst_18 = arith.constant dense<0.000000e+00> : vector<1xf32>
    %57 = vector.multi_reduction <add>, %56, %cst_18 [1, 2] : vector<1x8x240xf32> to vector<1xf32>
    %58 = vector.shape_cast %57 : vector<1xf32> to vector<1x1x1xf32>
    %59 = vector.extract %58[0, 0, 0] : f32 from vector<1x1x1xf32>
    %60 = vector.broadcast %59 : f32 to vector<1x1xf32>
    %61 = arith.addf %55, %60 : vector<1x1xf32>
    %c0_19 = arith.constant 0 : index
    %c0_20 = arith.constant 0 : index
    %62 = vector.load %arg7[%c0_19, %c0_20] : memref<1x1xf32, #tpu.memory_space<vmem>>, vector<1x1xf32>
    tpu.vector_store %arg7[%c0_19, %c0_20], %61 {strides = array<i32>} : memref<1x1xf32, #tpu.memory_space<vmem>>, vector<1x1xf32>,
    return
  }
  func.func @transform_0(%arg0: i32, %arg1: i32) -> (i32, i32) {
    %c1_i32 = arith.constant 1 : i32
    %0 = arith.muli %arg0, %c1_i32 : i32
    %1 = arith.addi %0, %arg1 : i32
    %c0_i32 = arith.constant 0 : i32
    %c0_i32_0 = arith.constant 0 : i32
    return %1, %c0_i32 : i32, i32
  }
  func.func @transform_1(%arg0: i32, %arg1: i32) -> (i32, i32) {
    %c1_i32 = arith.constant 1 : i32
    %0 = arith.muli %arg0, %c1_i32 : i32
    %1 = arith.addi %0, %arg1 : i32
    %c0_i32 = arith.constant 0 : i32
    %c0_i32_0 = arith.constant 0 : i32
    return %1, %c0_i32 : i32, i32
  }
  func.func @transform_2(%arg0: i32, %arg1: i32) -> (i32, i32) {
    %c1_i32 = arith.constant 1 : i32
    %0 = arith.muli %arg0, %c1_i32 : i32
    %1 = arith.addi %0, %arg1 : i32
    %c0_i32 = arith.constant 0 : i32
    %c0_i32_0 = arith.constant 0 : i32
    return %1, %c0_i32 : i32, i32
  }
  func.func @transform_3(%arg0: i32, %arg1: i32) -> (i32, i32) {
    %c0_i32 = arith.constant 0 : i32
    %c0_i32_0 = arith.constant 0 : i32
    %c0_i32_1 = arith.constant 0 : i32
    return %c0_i32, %c0_i32_0 : i32, i32
  }
  func.func @transform_4(%arg0: i32, %arg1: i32) -> (i32, i32) {
    %c0_i32 = arith.constant 0 : i32
    %c0_i32_0 = arith.constant 0 : i32
    return %arg0, %c0_i32 : i32, i32
  }
  func.func @transform_5(%arg0: i32, %arg1: i32) -> (i32, i32) {
    %c0_i32 = arith.constant 0 : i32
    %c0_i32_0 = arith.constant 0 : i32
    return %arg0, %c0_i32 : i32, i32
  }
}

</mosaic_0001>

<bundles_post_ra>
// kernel: tpu_custom_call.1
= control target key start
LH: loop header
LB: loop body
LE: loop exit
PB: predicated region body
PF: predicated region fallthrough
CT: control target
= control target key end

     0   :  { %11 = vsyncpa [#allocation3], 0  ;;  %s562_s0 = inlined_call_operand.hbm [shape: f32[8,256], index: 0, kind: input, shape index: {}]   ;;  %s563_s1 = inlined_call_operand.hbm [shape: f32[8,256], index: 1, kind: input, shape index: {}]   ;;  %s564_s2 = inlined_call_operand.hbm [shape: f32[8,256], index: 2, kind: input, shape index: {}]   ;;  %s565_s3 = inlined_call_operand.vmem [shape: f32[1,240], index: 3, kind: input, shape index: {}]   ;;  %s566_s4 = inlined_call_operand.hbm [shape: f32[1,1], index: 4, kind: output, shape index: {0}]   ;;  %s567_s5 = inlined_call_operand.hbm [shape: f32[1,1], index: 5, kind: output, shape index: {1}]  }
   0x1   :  { %12 = vsyncpa [#allocation6], 0 }
   0x2   :  { %13 = vsyncpa [#allocation4], 0 }
   0x3   :  { %14 = vsyncpa [#allocation10], 0  ;;  %s451_s18 = smov [#allocation5]   ;;  %s452_s20 = smov [#allocation2]  }
   0x4   :  { %s39_s19 = sshll.u32 %s451_s18, 4  ;;  %s25_s21 = sshll.u32 %s452_s20, 4  ;;  %s40_s19 = int_to_ptr.vmem [resolvable:$true] %s39_s19  ;;  %s26_s21 = int_to_ptr.vmem [resolvable:$true] %s25_s21 }
   0x5   :  { %s351_s22 = scalar_lea.vmem %s40_s19, 256  ;;  %p356_p1 = scmp.lt.s32.totalorder %s40_s19, %s40_s19 }
   0x6   :  { %p352_p0 = scmp.ne.s32.totalorder %s40_s19, %s351_s22  ;;  %p357_p2 = scmp.lt.s32.totalorder %s351_s22, %s351_s22 }
   0x8   :  { %p358_p3 = por %p357_p2, %p356_p1 }
   0xa   :  { %p359_p4 = pnand %p358_p3, %p352_p0 }
   0xc   :  { %362 = shalt.err (!%p359_p4)
}
   0xd   :  { %42 = dma.hbm_to_vmem [thread:$0]  %s563_s1, 256, %s40_s19, [#allocation6]  }
   0xe   :  { %s371_s25 = scalar_lea.vmem %s26_s21, 256  ;;  %p376_p6 = scmp.lt.s32.totalorder %s26_s21, %s26_s21 }
   0xf   :  { %p372_p5 = scmp.ne.s32.totalorder %s26_s21, %s371_s25  ;;  %p377_p7 = scmp.lt.s32.totalorder %s371_s25, %s371_s25 }
  0x11   :  { %p378_p8 = por %p377_p7, %p376_p6 }
  0x13   :  { %p379_p9 = pnand %p378_p8, %p372_p5 }
  0x15   :  { %382 = shalt.err (!%p379_p9)
}
  0x16   :  { %28 = dma.hbm_to_vmem [thread:$0]  %s562_s0, 256, %s26_s21, [#allocation3]  }
  0x17   :  { %s453_s28 = smov [#allocation7]  }
  0x18   :  { %s53_s29 = sshll.u32 %s453_s28, 4  ;;  %s54_s29 = int_to_ptr.vmem [resolvable:$true] %s53_s29 }
  0x19   :  { %s391_s30 = scalar_lea.vmem %s54_s29, 256  ;;  %p396_p11 = scmp.lt.s32.totalorder %s54_s29, %s54_s29 }
  0x1a   :  { %p392_p10 = scmp.ne.s32.totalorder %s54_s29, %s391_s30  ;;  %p397_p12 = scmp.lt.s32.totalorder %s391_s30, %s391_s30 }
  0x1c   :  { %p398_p13 = por %p397_p12, %p396_p11 }
  0x1e   :  { %p399_p0 = pnand %p398_p13, %p392_p10 }
  0x20   :  { %402 = shalt.err (!%p399_p0)
}
  0x21   :  { %56 = dma.hbm_to_vmem [thread:$0]  %s564_s2, 256, %s54_s29, [#allocation6]  }
  0x22   :  { %443 = dma.done.wait [#allocation3], 256  }
  0x23   :  { %444 = vsyncadd [#allocation3], 4294967040 }
  0x24   :  { %445 = dma.done.wait [#allocation6], 512  }
  0x25   :  { %446 = vsyncadd [#allocation6], 4294966784  ;;  %v500_v0 = vld [vmem:[#allocation5] sm:$0xff]  ;;  %v502_v1 = vld [vmem:[#allocation2] sm:$0xff]  ;;  %s454_s0 = smov 16   ;;  %s455_s2 = smov 1   ;;  %v221_v19 = vlaneseq }
  0x26   :  { %118 = vrot.lane.b32.xlu1 %v500_v0, %s454_s0  ;;  %97 = vrot.lane.b32.xlu0 %v502_v1, %s454_s0  ;;  %v506_v2 = vld [vmem:[#allocation5 + $0x8] sm:$0xff]  ;;  %v79_v3 = vld [vmem:[#allocation2 + $0x8] sm:$0xff]  ;;  %v511_v5 = vld [vmem:[#allocation7] sm:$0xff]  ;;  %vm101_vm0 = vcmask 130048   ;;  %s456_s7 = smov 113   ;;  %vm91_vm1 = vcmask 7168  }
  0x27   :  { %v509_v4 = vld [vmem:[#allocation7 + $0x8] sm:$0xff]  ;;  %v222_v22 = vshrl.u32 %v221_v19, 7  ;;  %v84_v27 = vld [vmem:[%s565_s3] sm:$0x3]  ;;  %vm157_vm2 = vcmask 924672   ;;  %s457_s3 = smov 127  }
  0x28   :  { %vm251_vm3 = vcmask 916480   ;;  %vm247_vm4 = vcmask 1039360   ;;  %vm75_vm5 = vcmask 0   ;;  %s459_s10 = smov [#allocation8]   ;;  %s460_s13 = smov [#allocation9]  }
  0x29   :  { %v223_v26 = vsub.s32 0, %v222_v22  ;;  %v227_v32 = vsub.s32 1, %v222_v22  ;;  %s297_s11 = sshll.u32 %s459_s10, 4  ;;  %s307_s14 = sshll.u32 %s460_s13, 4  ;;  %s298_s11 = int_to_ptr.vmem [resolvable:$true] %s297_s11  ;;  %s308_s14 = int_to_ptr.vmem [resolvable:$true] %s307_s14 }
  0x2a   :  { %120 = vrot.lane.b32.xlu1 %v506_v2, %s454_s0  ;;  %99 = vrot.lane.b32.xlu0 %v79_v3, %s454_s0  ;;  %s403_s16 = scalar_lea.vmem %s298_s11, 16  ;;  %s407_s17 = scalar_lea.vmem %s298_s11, 32 }
  0x2b   :  { %v224_v30 = vrot.slane %v84_v27, %v223_v26  ;;  %v228_v33 = vrot.slane %v84_v27, %v227_v32  ;;  %p404_p1 = scmp.ne.s32.totalorder %s298_s11, %s403_s16  ;;  %p408_p2 = scmp.lt.s32.totalorder %s298_s11, %s298_s11 }
  0x2c   :  { %p409_p3 = scmp.lt.s32.totalorder %s407_s17, %s403_s16 }
  0x2e   :  { %140 = vrot.lane.b32.xlu1 %v509_v4, %s454_s0  ;;  %138 = vrot.lane.b32.xlu0 %v511_v5, %s454_s0  ;;  %p410_p4 = por %p409_p3, %p408_p2 }
  0x30   :  { %p411_p5 = pnand %p410_p4, %p404_p1 }
  0x32   :  { %87 = vrot.lane.b32.xlu0 %v502_v1, %s455_s2  ;;  %89 = vrot.lane.b32.xlu1 %v79_v3, %s455_s2 }
  0x36   :  { %109 = vrot.lane.b32.xlu0 %v500_v0, %s455_s2  ;;  %111 = vrot.lane.b32.xlu1 %v506_v2, %s455_s2 }
  0x98   :  { %v119_v6 = vpop.permute.xlu1 %118  ;;  %v98_v7 = vpop.permute.xlu0 %97 }
  0x99   :  { %v105_v8 = vsub.f32 %v502_v1, %v98_v7  ;;  %v125_v9 = vsub.f32 %v500_v0, %v119_v6 }
  0x9b   :  { %v165_v10 = vmul.f32 %v105_v8, %v105_v8  ;;  %v180_v13 = vmul.f32 %v125_v9, %v125_v9  ;;  %v149_v20 = vmul.f32 %v125_v9, %v105_v8 }
  0x9c   :  { %v121_v11 = vpop.permute.xlu1 %120  ;;  %v100_v12 = vpop.permute.xlu0 %99 }
  0x9d   :  { %v122_v14 = vsel %vm101_vm0, %v119_v6, %v121_v11  ;;  %v102_v15 = vsel %vm101_vm0, %v98_v7, %v100_v12  ;;  %169 = vrot.lane.b32.xlu0 %v165_v10, %s456_s7 }
  0x9e   :  { %v106_v16 = vsub.f32 %v79_v3, %v102_v15  ;;  %v126_v17 = vsub.f32 %v506_v2, %v122_v14 }
  0xa0   :  { %v166_v18 = vmul.f32 %v106_v16, %v106_v16  ;;  %v181_v21 = vmul.f32 %v126_v17, %v126_v17  ;;  %v139_v23 = vpop.permute.xlu0 %138  ;;  %v141_v24 = vpop.permute.xlu1 %140  ;;  %v150_v29 = vmul.f32 %v126_v17, %v106_v16 }
  0xa1   :  { %184 = vrot.lane.b32.xlu0 %v180_v13, %s456_s7  ;;  %v145_v25 = vmul.f32 %v139_v23, %v511_v5  ;;  %v142_v28 = vsel %vm101_vm0, %v139_v23, %v141_v24 }
  0xa2   :  { %171 = vrot.lane.b32.xlu1 %v166_v18, %s456_s7  ;;  %v146_v31 = vmul.f32 %v142_v28, %v509_v4 }
  0xa4   :  { %v88_v34 = vpop.permute.xlu0 %87  ;;  %v90_v35 = vpop.permute.xlu1 %89 }
  0xa5   :  { %153 = vrot.lane.b32.xlu0 %v149_v20, %s456_s7  ;;  %v92_v37 = vsel %vm91_vm1, %v88_v34, %v90_v35  ;;  %v95_v41 = vsub.f32 %v502_v1, %v88_v34 }
  0xa6   :  { %186 = vrot.lane.b32.xlu1 %v181_v21, %s456_s7  ;;  %v96_v38 = vsub.f32 %v79_v3, %v92_v37 }
  0xa7   :  { %v163_v45 = vmul.f32 %v95_v41, %v95_v41 }
  0xa8   :  { %v110_v36 = vpop.permute.xlu0 %109  ;;  %v112_v39 = vpop.permute.xlu1 %111  ;;  %v164_v44 = vmul.f32 %v96_v38, %v96_v38 }
  0xa9   :  { %129 = vrot.lane.b32.xlu0 %v511_v5, %s455_s2  ;;  %v113_v42 = vsel %vm91_vm1, %v110_v36, %v112_v39  ;;  %v116_v50 = vsub.f32 %v500_v0, %v110_v36 }
  0xaa   :  { %131 = vrot.lane.b32.xlu1 %v509_v4, %s455_s2  ;;  %v117_v47 = vsub.f32 %v506_v2, %v113_v42 }
  0xab   :  { %v178_v54 = vmul.f32 %v116_v50, %v116_v50  ;;  %v147_v8 = vmul.f32 %v116_v50, %v95_v41 }
  0xac   :  { %v179_v53 = vmul.f32 %v117_v47, %v117_v47  ;;  %v148_v6 = vmul.f32 %v117_v47, %v96_v38 }
  0xad   :  { %211 = vrot.lane.b32.xlu0 %v145_v25, %s456_s7 }
  0xae   :  { %155 = vrot.lane.b32.xlu1 %v150_v29, %s456_s7 }
  0xb1   :  { %229 = vrot.lane.b32.xlu0 %v224_v30, %s455_s2 }
  0xb2   :  { %213 = vrot.lane.b32.xlu1 %v146_v31, %s456_s7 }
  0xb6   :  { %231 = vrot.lane.b32.xlu1 %v228_v33, %s455_s2 }
 0x10f   :  { %v170_v40 = vpop.permute.xlu0 %169 }
 0x113   :  { %v185_v43 = vpop.permute.xlu0 %184 }
 0x114   :  { %v172_v46 = vpop.permute.xlu1 %171 }
 0x115   :  { %v173_v48 = vsel %vm157_vm2, %v170_v40, %v172_v46  ;;  %v177_v49 = vadd.f32 %v172_v46, %v164_v44  ;;  %v458_v44 = vmov 0.0  }
 0x116   :  { %v176_v51 = vadd.f32 %v173_v48, %v163_v45  ;;  %76 = vst.msk [vmem:[#allocation8] sm:$0x1] %vm75_vm5, %v458_v44  ;;  %77 = vst.msk [vmem:[#allocation9] sm:$0x1] %vm75_vm5, %v458_v44 }
 0x117   :  { %v196_v52 = vadd.f32 1.0, %v177_v49  ;;  %v154_v57 = vpop.permute.xlu0 %153 }
 0x118   :  { %v195_v55 = vadd.f32 1.0, %v176_v51  ;;  %v187_v56 = vpop.permute.xlu1 %186 }
 0x119   :  { %v188_v58 = vsel %vm157_vm2, %v185_v43, %v187_v56  ;;  %v192_v59 = vadd.f32 %v187_v56, %v179_v53  ;;  %335 = vrsqrt.f32 %v196_v52 }
 0x11a   :  { %v191_v60 = vadd.f32 %v188_v58, %v178_v54  ;;  %337 = vrsqrt.f32 %v195_v55 }
 0x11b   :  { %v200_v61 = vadd.f32 1.0, %v192_v59  ;;  %v130_v1 = vpop.permute.xlu0 %129 }
 0x11c   :  { %v199_v62 = vadd.f32 1.0, %v191_v60  ;;  %v132_v63 = vpop.permute.xlu1 %131  ;;  %v136_v13 = vmul.f32 %v130_v1, %v511_v5 }
 0x11d   :  { %339 = vrsqrt.f32 %v200_v61  ;;  %v133_v9 = vsel %vm91_vm1, %v130_v1, %v132_v63  ;;  %v240_v59 = vld [vmem:[#allocation8] sm:$0x1] }
 0x11e   :  { %341 = vrsqrt.f32 %v199_v62  ;;  %v137_v15 = vmul.f32 %v133_v9, %v509_v4  ;;  %v267_v62 = vld [vmem:[#allocation9] sm:$0x1] }
 0x11f   :  { %v212_v2 = vpop.permute.xlu0 %211 }
 0x120   :  { %v156_v0 = vpop.permute.xlu1 %155 }
 0x121   :  { %v158_v7 = vsel %vm157_vm2, %v154_v57, %v156_v0  ;;  %v162_v10 = vadd.f32 %v156_v0, %v148_v6 }
 0x122   :  { %v161_v12 = vadd.f32 %v158_v7, %v147_v8 }
 0x123   :  { %v230_v18 = vpop.permute.xlu0 %229  ;;  %v194_v21 = vadd.f32 1.0, %v162_v10 }
 0x124   :  { %v214_v3 = vpop.permute.xlu1 %213  ;;  %v193_v23 = vadd.f32 1.0, %v161_v12 }
 0x125   :  { %v215_v16 = vsel %vm157_vm2, %v212_v2, %v214_v3  ;;  %v219_v28 = vmul.f32 %v214_v3, %v137_v15 }
 0x126   :  { %v336_v11 = vpop.eup %335  ;;  %v218_v25 = vmul.f32 %v215_v16, %v136_v13 }
 0x127   :  { %v338_v14 = vpop.eup %337 }
 0x128   :  { %v232_v17 = vpop.permute.xlu1 %231  ;;  %v236_v4 = vmul.f32 %v230_v18, %v218_v25 }
 0x129   :  { %v233_v26 = vsel %vm91_vm1, %v230_v18, %v232_v17 }
 0x12a   :  { %v340_v19 = vpop.eup %339  ;;  %v237_v30 = vmul.f32 %v233_v26, %v219_v28 }
 0x12b   :  { %v342_v20 = vpop.eup %341  ;;  %v204_v22 = vmul.f32 %v340_v19, %v336_v11 }
 0x12c   :  { %v203_v24 = vmul.f32 %v342_v20, %v338_v14 }
 0x12d   :  { %v206_v27 = vmul.f32 %v204_v22, %v194_v21 }
 0x12e   :  { %v205_v29 = vmul.f32 %v203_v24, %v193_v23 }
 0x12f   :  { %v208_v5 = vsub.f32 1.0, %v206_v27 }
 0x130   :  { %v207_v31 = vsub.f32 1.0, %v205_v29 }
 0x131   :  { %v239_v32 = vmul.f32 %v237_v30, %v208_v5 }
 0x132   :  { %v238_v33 = vmul.f32 %v236_v4, %v207_v31 }
 0x133   :  { %245 = vrot.lane.b32.xlu1 %v239_v32, %s457_s3 }
 0x134   :  { %243 = vrot.lane.b32.xlu0 %v238_v33, %s457_s3 }
 0x137   :  { %272 = vrot.lane.b32.xlu1 %v237_v30, %s457_s3 }
 0x138   :  { %270 = vrot.lane.b32.xlu0 %v236_v4, %s457_s3 }
 0x1a5   :  { %v246_v34 = vpop.permute.xlu1 %245 }
 0x1a6   :  { %v252_v35 = vsel %vm251_vm3, %v246_v34, 0.0  ;;  %v244_v36 = vpop.permute.xlu0 %243 }
 0x1a7   :  { %v248_v37 = vsel %vm247_vm4, %v244_v36, %v246_v34 }
 0x1a8   :  { %v253_v38 = vadd.f32 %v252_v35, %v248_v37 }
 0x1a9   :  { %v273_v39 = vpop.permute.xlu1 %272 }
 0x1aa   :  { %v277_v40 = vsel %vm251_vm3, %v273_v39, 0.0  ;;  %v271_v41 = vpop.permute.xlu0 %270  ;;  %254 = vadd.xlane.f32.xlu0 %v253_v38 }
 0x1ab   :  { %v274_v42 = vsel %vm247_vm4, %v271_v41, %v273_v39 }
 0x1ac   :  { %v278_v43 = vadd.f32 %v277_v40, %v274_v42 }
 0x1ae   :  { %279 = vadd.xlane.f32.xlu1 %v278_v43 }
 0x233   :  { %v255_v45 = vpop.xlane.xlu0 %254 }
 0x234   :  { %v256_v46 = vrot.slane %v255_v45, 4 }
 0x236   :  { %v257_v47 = vadd.f32 %v256_v46, %v255_v45 }
 0x237   :  { %v280_v48 = vpop.xlane.xlu1 %279 }
 0x238   :  { %v258_v49 = vrot.slane %v257_v47, 2  ;;  %v281_v50 = vrot.slane %v280_v48, 4 }
 0x23a   :  { %v282_v51 = vadd.f32 %v281_v50, %v280_v48  ;;  %v259_v52 = vadd.f32 %v258_v49, %v257_v47 }
 0x23c   :  { %v283_v53 = vrot.slane %v282_v51, 2  ;;  %v260_v54 = vrot.slane %v259_v52, 1 }
 0x23e   :  { %v284_v55 = vadd.f32 %v283_v53, %v282_v51  ;;  %v261_v56 = vadd.f32 %v260_v54, %v259_v52 }
 0x240   :  { %321 = vpush %v261_v56  ;;  %v285_v57 = vrot.slane %v284_v55, 1 }
 0x242   :  { %v286_v58 = vadd.f32 %v285_v57, %v284_v55 }
 0x244   :  { %323 = vpush %v286_v58 }
 0x271   :  { %s322_s12 = spop %321 }
 0x272   :  { %v263_v60 = vstv %s322_s12 }
 0x273   :  { %v264_v61 = vadd.f32 %v263_v60, %v240_v59 }
 0x275   :  { %266 = vst.msk [vmem:[#allocation8] sm:$0x1] %vm75_vm5, %v264_v61  ;;  %s324_s15 = spop %323 }
 0x276   :  { %v288_v63 = vstv %s324_s15 }
 0x277   :  { %414 = shalt.err (!%p411_p5)
}
 0x278   :  { %300 = dma.vmem_to_hbm [thread:$0]  %s298_s11, 16, %s566_s4, [#allocation4]   ;;  %v289_v1 = vadd.f32 %v288_v63, %v267_v62 }
 0x279   :  { %s423_s20 = scalar_lea.vmem %s308_s14, 16  ;;  %s427_s21 = scalar_lea.vmem %s308_s14, 32 }
 0x27a   :  { %290 = vst.msk [vmem:[#allocation9] sm:$0x1] %vm75_vm5, %v289_v1  ;;  %p424_p6 = scmp.ne.s32.totalorder %s308_s14, %s423_s20  ;;  %p428_p7 = scmp.lt.s32.totalorder %s308_s14, %s308_s14 }
 0x27b   :  { %p429_p8 = scmp.lt.s32.totalorder %s427_s21, %s423_s20 }
 0x27d   :  { %p430_p9 = por %p429_p8, %p428_p7 }
 0x27f   :  { %p431_p10 = pnand %p430_p9, %p424_p6 }
 0x281   :  { %434 = shalt.err (!%p431_p10)
}
 0x282   :  { %310 = dma.vmem_to_hbm [thread:$0]  %s308_s14, 16, %s567_s5, [#allocation10]  }
 0x283   :  { %447 = dma.done.wait [#allocation4], 16  }
 0x284   :  { %448 = vsyncadd [#allocation4], 4294967280 }
 0x285   :  { %449 = dma.done.wait [#allocation10], 16  }
 0x286   :  { %450 = vsyncadd [#allocation10], 4294967280 }
 0x287   :  { %317 = vsyncpa [#allocation3], 1 }
 0x288   :  { %318 = vsyncpa [#allocation6], 1 }
 0x289   :  { %319 = vsyncpa [#allocation4], 1 }
 0x28a   :  { %320 = vsyncpa [#allocation10], 1 }

</bundles_post_ra>
